<compile_context>
chip_gen: v7x
topology: tpu7x:2x2x1
jax: 0.10.0
libtpu: 0.0.40
codegen_flags: <defaults>
</compile_context>

<pallas_src>
import functools

import jax
import jax.numpy as jnp
from jax import lax
from jax.experimental import pallas as pl
from jax.experimental.pallas import tpu as pltpu

LANE = 128  # all hidden / output widths are padded to a full vreg lane width


def _round_up(x, m):
    return -(-x // m) * m


def _pad2(a, rows, cols):
    r, c = a.shape
    return jnp.pad(a, ((0, rows - r), (0, cols - c)))


def bow_kernel(x_ref, w1_ref, b1_ref, w2_ref, b2_ref, w3_ref, b3_ref,
               w4_ref, b4_ref, o_ref, acc_ref, *, valid_v, tk, mask_k_tail):
    k = pl.program_id(1)

    @pl.when(k == 0)
    def _():
        acc_ref[...] = jnp.zeros_like(acc_ref)

    # x arrives in its native f32 and is cast to bf16 here (VPU, hidden under
    # the layer-1 MXU / DMA); w1 was packed to bf16 once in pack_params.
    x = x_ref[...]
    if mask_k_tail:
        # Vocab is not a multiple of tk: zero the columns past the real vocab so
        # garbage in the out-of-bounds part of the last K block cannot reach the
        # accumulator (w1's padded rows are explicit zeros, but 0*NaN != 0).
        col = lax.broadcasted_iota(jnp.int32, x.shape, 1) + k * tk
        x = jnp.where(col < valid_v, x, 0.0)
    acc_ref[...] += jnp.dot(x.astype(jnp.bfloat16), w1_ref[...],
                            preferred_element_type=jnp.float32)

    # bias1 + ReLU and the tiny lane-dense layers 2-4 run once, on the last K step.
    @pl.when(k == pl.num_programs(1) - 1)
    def _():
        h = jnp.maximum(acc_ref[...] + b1_ref[...], 0.0)
        h = jnp.dot(h, w2_ref[...], preferred_element_type=jnp.float32)
        h = jnp.maximum(h + b2_ref[...], 0.0)
        h = jnp.dot(h, w3_ref[...], preferred_element_type=jnp.float32)
        h = jnp.maximum(h + b3_ref[...], 0.0)
        h = jnp.dot(h, w4_ref[...], preferred_element_type=jnp.float32)
        o_ref[...] = (h + b4_ref[...]).astype(o_ref.dtype)


def pack_params(params, *, tk=512):
    """One-time weight packing for the kernel (call once, reuse every forward).

    * hidden/output widths (64/32/16/6) are zero-padded to 128 lanes so every
      bias-add / ReLU / store is lane-dense,
    * w1 is cast to bf16 and its vocab dim zero-padded to a multiple of the
      K tile so the streamed (tk, 128) blocks never read past the real weights,
    * zero padding keeps the math exact (padded rows/cols contribute 0).
    """
    V = int(params["w1"].shape[0])
    tk_eff = V if V <= tk else int(tk)
    v_pad = _round_up(V, tk_eff)
    return dict(
        v=V, v_pad=int(v_pad), tk=int(tk_eff),
        n_out=int(params["w4"].shape[1]),
        w1=_pad2(params["w1"], v_pad, LANE).astype(jnp.bfloat16),   # [V_pad,128] bf16
        b1=_pad2(params["b1"], 1, LANE).astype(jnp.float32),
        w2=_pad2(params["w2"], LANE, LANE).astype(jnp.float32),
        b2=_pad2(params["b2"], 1, LANE).astype(jnp.float32),
        w3=_pad2(params["w3"], LANE, LANE).astype(jnp.float32),
        b3=_pad2(params["b3"], 1, LANE).astype(jnp.float32),
        w4=_pad2(params["w4"], LANE, LANE).astype(jnp.float32),
        b4=_pad2(params["b4"], 1, LANE).astype(jnp.float32),
    )


def bow_forward(x, packed, *, tb=512, out_dtype=jnp.bfloat16):
    """x: [B, V] float32; packed: output of pack_params. Returns [B, 6] float32."""
    B, V = x.shape
    assert V == packed["v"], (V, packed["v"])
    tk = packed["tk"]
    v_pad = packed["v_pad"]
    n_out = packed["n_out"]

    # Batch tile: whole batch when small (full-extent block, no padding copy);
    # otherwise a fixed MXU-filling tile.  pl.cdiv lets Pallas mask the ragged
    # last tile instead of paying a wrapper-side jnp.pad copy of all of x.
    if B <= tb:
        tb_eff = B
        grid_b = 1
    else:
        tb_eff = tb                      # 512: multiple of 16, fills the MXU M dim
        grid_b = pl.cdiv(B, tb_eff)
    grid_k = v_pad // tk

    kernel = functools.partial(
        bow_kernel, valid_v=V, tk=tk, mask_k_tail=(v_pad != V))

    const = lambda a: pl.BlockSpec(a.shape, lambda i, k: (0, 0))

    flops = 2 * B * (v_pad * LANE + 3 * LANE * LANE)
    bytes_accessed = int(
        x.size * jnp.dtype(x.dtype).itemsize                # streamed f32 x
        + packed["w1"].size * 2                             # streamed bf16 w1
        + 4 * sum(packed[n].size for n in ("w2", "w3", "w4",
                                           "b1", "b2", "b3", "b4"))
        + B * LANE * jnp.dtype(out_dtype).itemsize)         # bf16 output writeback

    out_pad = pl.pallas_call(
        kernel,
        out_shape=jax.ShapeDtypeStruct((B, LANE), out_dtype),
        grid_spec=pltpu.PrefetchScalarGridSpec(
            num_scalar_prefetch=0,
            grid=(grid_b, grid_k),                              # reduction axis last
            in_specs=[
                pl.BlockSpec((tb_eff, tk), lambda i, k: (i, k)),   # x: streamed f32
                pl.BlockSpec((tk, LANE), lambda i, k: (k, 0)),     # w1: streamed bf16
                const(packed["b1"]),
                const(packed["w2"]), const(packed["b2"]),
                const(packed["w3"]), const(packed["b3"]),
                const(packed["w4"]), const(packed["b4"]),
            ],
            out_specs=pl.BlockSpec((tb_eff, LANE), lambda i, k: (i, 0)),
            scratch_shapes=[pltpu.VMEM((tb_eff, LANE), jnp.float32)],  # layer-1 acc
        ),
        compiler_params=pltpu.CompilerParams(
            dimension_semantics=("parallel", "arbitrary"),
            vmem_limit_bytes=32 * 1024 * 1024),
        cost_estimate=pl.CostEstimate(
            flops=flops, transcendentals=0, bytes_accessed=bytes_accessed),
    )(x, packed["w1"], packed["b1"], packed["w2"], packed["b2"],
      packed["w3"], packed["b3"], packed["w4"], packed["b4"])

    return out_pad[:, :n_out].astype(jnp.float32)


def init_params(key, vocab_size):
    """Deterministic init mimicking nn.Linear's U(-1/sqrt(fan_in), 1/sqrt(fan_in)).
    Weights are stored transposed: [in_features, out_features]."""
    dims = [(vocab_size, 64), (64, 32), (32, 16), (16, 6)]
    params = {}
    for idx, (fin, fout) in enumerate(dims, start=1):
        key, kw, kb = jax.random.split(key, 3)
        bound = 1.0 / jnp.sqrt(fin)
        params[f"w{idx}"] = jax.random.uniform(
            kw, (fin, fout), jnp.float32, -bound, bound)
        params[f"b{idx}"] = jax.random.uniform(
            kb, (1, fout), jnp.float32, -bound, bound)
    return params


def bow_reference(x, params, *, bf16_layer1=True):
    """Pure-JAX reference; optionally matches the kernel's bf16 layer-1 matmul."""
    if bf16_layer1:
        h = jnp.dot(x.astype(jnp.bfloat16), params["w1"].astype(jnp.bfloat16),
                    preferred_element_type=jnp.float32)
    else:
        h = x @ params["w1"]
    h = jnp.maximum(h + params["b1"], 0.0)
    h = jnp.maximum(h @ params["w2"] + params["b2"], 0.0)
    h = jnp.maximum(h @ params["w3"] + params["b3"], 0.0)
    return h @ params["w4"] + params["b4"]


def _check(out, x, params):
    # tight check vs a dtype-matched (bf16 layer-1) reference; kernel output is
    # stored in bf16, so allow ~1 bf16 ulp.
    ref_bf16 = bow_reference(x, params, bf16_layer1=True)
    assert jnp.allclose(out, ref_bf16, atol=1e-2, rtol=1e-2), \
        "mismatch vs bf16-matched reference"
    # loose sanity check vs the full-f32 reference (bf16 quantization only)
    ref_f32 = bow_reference(x, params, bf16_layer1=False)
    assert jnp.allclose(out, ref_f32, atol=5e-2, rtol=5e-2), \
        "mismatch vs f32 reference"


if __name__ == "__main__":
    key = jax.random.PRNGKey(0)

    # --- small demo shape (single tile, vocab fits one K block) -------------
    vocab_size = 128
    batch = 8
    kx, kp = jax.random.split(key)
    x = jax.random.uniform(kx, (batch, vocab_size), jnp.float32)
    params = init_params(kp, vocab_size)
    packed = pack_params(params)                 # one-time packing (hoisted)

    out = bow_forward(x, packed)
    out = jax.block_until_ready(out)
    assert out.shape == (batch, 6), out.shape
    _check(out, x, params)

    # --- streamed path: ragged batch tiles + K-tiled ragged vocab -----------
    vocab2, batch2 = 640, 530                    # grid=(2, 2), both axes ragged
    kx2, kp2 = jax.random.split(kp)
    x2 = jax.random.uniform(kx2, (batch2, vocab2), jnp.float32)
    params2 = init_params(kp2, vocab2)
    packed2 = pack_params(params2)
    out2 = jax.block_until_ready(bow_forward(x2, packed2))
    assert out2.shape == (batch2, 6), out2.shape
    _check(out2, x2, params2)

    print("KERNEL_OK")
</pallas_src>

<mosaic_0001>
module attributes {stable_mosaic.version = 11 : i64} {
  func.func @bow_kernel(%arg0: i32, %arg1: i32, %arg2: memref<8x128xf32, #tpu.memory_space<vmem>>, %arg3: memref<128x128xbf16, #tpu.memory_space<vmem>>, %arg4: memref<1x128xf32, #tpu.memory_space<vmem>>, %arg5: memref<128x128xf32, #tpu.memory_space<vmem>>, %arg6: memref<1x128xf32, #tpu.memory_space<vmem>>, %arg7: memref<128x128xf32, #tpu.memory_space<vmem>>, %arg8: memref<1x128xf32, #tpu.memory_space<vmem>>, %arg9: memref<128x128xf32, #tpu.memory_space<vmem>>, %arg10: memref<1x128xf32, #tpu.memory_space<vmem>>, %arg11: memref<8x128xbf16, #tpu.memory_space<vmem>>, %arg12: memref<8x128xf32, #tpu.memory_space<vmem>>) attributes {dimension_semantics = [#tpu.dimension_semantics<parallel>, #tpu.dimension_semantics<arbitrary>], iteration_bounds = array<i64: 1, 1>, scalar_prefetch = 0 : i64, scratch_operands = 1 : i64, tpu.core_type = #tpu.core_type<tc>, window_params = [{transform_indices = @transform_0, window_bounds = array<i64: 8, 128>}, {transform_indices = @transform_1, window_bounds = array<i64: 128, 128>}, {pipeline_mode = #tpu.pipeline_mode<synchronous>, transform_indices = @transform_2, window_bounds = array<i64: 1, 128>}, {pipeline_mode = #tpu.pipeline_mode<synchronous>, transform_indices = @transform_3, window_bounds = array<i64: 128, 128>}, {pipeline_mode = #tpu.pipeline_mode<synchronous>, transform_indices = @transform_4, window_bounds = array<i64: 1, 128>}, {pipeline_mode = #tpu.pipeline_mode<synchronous>, transform_indices = @transform_5, window_bounds = array<i64: 128, 128>}, {pipeline_mode = #tpu.pipeline_mode<synchronous>, transform_indices = @transform_6, window_bounds = array<i64: 1, 128>}, {pipeline_mode = #tpu.pipeline_mode<synchronous>, transform_indices = @transform_7, window_bounds = array<i64: 128, 128>}, {pipeline_mode = #tpu.pipeline_mode<synchronous>, transform_indices = @transform_8, window_bounds = array<i64: 1, 128>}, {transform_indices = @transform_9, window_bounds = array<i64: 8, 128>}]} {
    %c0_i32 = arith.constant 0 : i32
    %0 = arith.cmpi eq, %arg1, %c0_i32 : i32
    %1 = arith.extui %0 : i1 to i32
    %c0_i32_0 = arith.constant 0 : i32
    %2 = arith.cmpi ne, %1, %c0_i32_0 : i32
    scf.if %2 {
      %cst_10 = arith.constant 0.000000e+00 : f32
      %13 = vector.broadcast %cst_10 : f32 to vector<8x128xf32>
      %c0_11 = arith.constant 0 : index
      %c0_12 = arith.constant 0 : index
      %14 = vector.load %arg12[%c0_11, %c0_12] : memref<8x128xf32, #tpu.memory_space<vmem>>, vector<8x128xf32>
      tpu.vector_store %arg12[%c0_11, %c0_12], %13 {strides = array<i32>} : memref<8x128xf32, #tpu.memory_space<vmem>>, vector<8x128xf32>,
    } else {
    }
    %c0 = arith.constant 0 : index
    %c0_1 = arith.constant 0 : index
    %3 = vector.load %arg2[%c0, %c0_1] : memref<8x128xf32, #tpu.memory_space<vmem>>, vector<8x128xf32>
    %c0_2 = arith.constant 0 : index
    %c0_3 = arith.constant 0 : index
    %4 = vector.load %arg12[%c0_2, %c0_3] : memref<8x128xf32, #tpu.memory_space<vmem>>, vector<8x128xf32>
    %5 = arith.truncf %3 : vector<8x128xf32> to vector<8x128xbf16>
    %c0_4 = arith.constant 0 : index
    %c0_5 = arith.constant 0 : index
    %6 = vector.load %arg3[%c0_4, %c0_5] : memref<128x128xbf16, #tpu.memory_space<vmem>>, vector<128x128xbf16>
    %cst = arith.constant dense<0.000000e+00> : vector<8x128xf32>
    %7 = tpu.matmul %5, %6, %cst {dimension_numbers = #tpu.dot_dimension_numbers<[1], [0], [0], [1], [0, 0, 1, 1], [], []>} : vector<8x128xbf16>, vector<128x128xbf16>, vector<8x128xf32> -> vector<8x128xf32>
    %8 = arith.addf %4, %7 : vector<8x128xf32>
    %c0_6 = arith.constant 0 : index
    %c0_7 = arith.constant 0 : index
    %9 = vector.load %arg12[%c0_6, %c0_7] : memref<8x128xf32, #tpu.memory_space<vmem>>, vector<8x128xf32>
    tpu.vector_store %arg12[%c0_6, %c0_7], %8 {strides = array<i32>} : memref<8x128xf32, #tpu.memory_space<vmem>>, vector<8x128xf32>,
    %c0_i32_8 = arith.constant 0 : i32
    %10 = arith.cmpi eq, %arg1, %c0_i32_8 : i32
    %11 = arith.extui %10 : i1 to i32
    %c0_i32_9 = arith.constant 0 : i32
    %12 = arith.cmpi ne, %11, %c0_i32_9 : i32
    scf.if %12 {
      %c0_10 = arith.constant 0 : index
      %c0_11 = arith.constant 0 : index
      %13 = vector.load %arg12[%c0_10, %c0_11] : memref<8x128xf32, #tpu.memory_space<vmem>>, vector<8x128xf32>
      %c0_12 = arith.constant 0 : index
      %c0_13 = arith.constant 0 : index
      %14 = vector.load %arg4[%c0_12, %c0_13] : memref<1x128xf32, #tpu.memory_space<vmem>>, vector<1x128xf32>
      %15 = vector.broadcast %14 : vector<1x128xf32> to vector<8x128xf32>
      %16 = arith.addf %13, %15 : vector<8x128xf32>
      %cst_14 = arith.constant 0.000000e+00 : f32
      %17 = vector.broadcast %cst_14 : f32 to vector<8x128xf32>
      %18 = arith.maximumf %16, %17 : vector<8x128xf32>
      %c0_15 = arith.constant 0 : index
      %c0_16 = arith.constant 0 : index
      %19 = vector.load %arg5[%c0_15, %c0_16] : memref<128x128xf32, #tpu.memory_space<vmem>>, vector<128x128xf32>
      %cst_17 = arith.constant dense<0.000000e+00> : vector<8x128xf32>
      %20 = tpu.matmul %18, %19, %cst_17 {dimension_numbers = #tpu.dot_dimension_numbers<[1], [0], [0], [1], [0, 0, 1, 1], [], []>} : vector<8x128xf32>, vector<128x128xf32>, vector<8x128xf32> -> vector<8x128xf32>
      %c0_18 = arith.constant 0 : index
      %c0_19 = arith.constant 0 : index
      %21 = vector.load %arg6[%c0_18, %c0_19] : memref<1x128xf32, #tpu.memory_space<vmem>>, vector<1x128xf32>
      %22 = vector.broadcast %21 : vector<1x128xf32> to vector<8x128xf32>
      %23 = arith.addf %20, %22 : vector<8x128xf32>
      %cst_20 = arith.constant 0.000000e+00 : f32
      %24 = vector.broadcast %cst_20 : f32 to vector<8x128xf32>
      %25 = arith.maximumf %23, %24 : vector<8x128xf32>
      %c0_21 = arith.constant 0 : index
      %c0_22 = arith.constant 0 : index
      %26 = vector.load %arg7[%c0_21, %c0_22] : memref<128x128xf32, #tpu.memory_space<vmem>>, vector<128x128xf32>
      %cst_23 = arith.constant dense<0.000000e+00> : vector<8x128xf32>
      %27 = tpu.matmul %25, %26, %cst_23 {dimension_numbers = #tpu.dot_dimension_numbers<[1], [0], [0], [1], [0, 0, 1, 1], [], []>} : vector<8x128xf32>, vector<128x128xf32>, vector<8x128xf32> -> vector<8x128xf32>
      %c0_24 = arith.constant 0 : index
      %c0_25 = arith.constant 0 : index
      %28 = vector.load %arg8[%c0_24, %c0_25] : memref<1x128xf32, #tpu.memory_space<vmem>>, vector<1x128xf32>
      %29 = vector.broadcast %28 : vector<1x128xf32> to vector<8x128xf32>
      %30 = arith.addf %27, %29 : vector<8x128xf32>
      %cst_26 = arith.constant 0.000000e+00 : f32
      %31 = vector.broadcast %cst_26 : f32 to vector<8x128xf32>
      %32 = arith.maximumf %30, %31 : vector<8x128xf32>
      %c0_27 = arith.constant 0 : index
      %c0_28 = arith.constant 0 : index
      %33 = vector.load %arg9[%c0_27, %c0_28] : memref<128x128xf32, #tpu.memory_space<vmem>>, vector<128x128xf32>
      %cst_29 = arith.constant dense<0.000000e+00> : vector<8x128xf32>
      %34 = tpu.matmul %32, %33, %cst_29 {dimension_numbers = #tpu.dot_dimension_numbers<[1], [0], [0], [1], [0, 0, 1, 1], [], []>} : vector<8x128xf32>, vector<128x128xf32>, vector<8x128xf32> -> vector<8x128xf32>
      %c0_30 = arith.constant 0 : index
      %c0_31 = arith.constant 0 : index
      %35 = vector.load %arg10[%c0_30, %c0_31] : memref<1x128xf32, #tpu.memory_space<vmem>>, vector<1x128xf32>
      %36 = vector.broadcast %35 : vector<1x128xf32> to vector<8x128xf32>
      %37 = arith.addf %34, %36 : vector<8x128xf32>
      %38 = arith.truncf %37 : vector<8x128xf32> to vector<8x128xbf16>
      %c0_32 = arith.constant 0 : index
      %c0_33 = arith.constant 0 : index
      %39 = vector.load %arg11[%c0_32, %c0_33] : memref<8x128xbf16, #tpu.memory_space<vmem>>, vector<8x128xbf16>
      tpu.vector_store %arg11[%c0_32, %c0_33], %38 {strides = array<i32>} : memref<8x128xbf16, #tpu.memory_space<vmem>>, vector<8x128xbf16>,
    } else {
    }
    return
  }
  func.func @transform_0(%arg0: i32, %arg1: i32) -> (i32, i32) {
    %c0_i32 = arith.constant 0 : i32
    return %arg0, %arg1 : i32, i32
  }
  func.func @transform_1(%arg0: i32, %arg1: i32) -> (i32, i32) {
    %c0_i32 = arith.constant 0 : i32
    %c0_i32_0 = arith.constant 0 : i32
    return %arg1, %c0_i32 : i32, i32
  }
  func.func @transform_2(%arg0: i32, %arg1: i32) -> (i32, i32) {
    %c0_i32 = arith.constant 0 : i32
    %c0_i32_0 = arith.constant 0 : i32
    %c0_i32_1 = arith.constant 0 : i32
    return %c0_i32, %c0_i32_0 : i32, i32
  }
  func.func @transform_3(%arg0: i32, %arg1: i32) -> (i32, i32) {
    %c0_i32 = arith.constant 0 : i32
    %c0_i32_0 = arith.constant 0 : i32
    %c0_i32_1 = arith.constant 0 : i32
    return %c0_i32, %c0_i32_0 : i32, i32
  }
  func.func @transform_4(%arg0: i32, %arg1: i32) -> (i32, i32) {
    %c0_i32 = arith.constant 0 : i32
    %c0_i32_0 = arith.constant 0 : i32
    %c0_i32_1 = arith.constant 0 : i32
    return %c0_i32, %c0_i32_0 : i32, i32
  }
  func.func @transform_5(%arg0: i32, %arg1: i32) -> (i32, i32) {
    %c0_i32 = arith.constant 0 : i32
    %c0_i32_0 = arith.constant 0 : i32
    %c0_i32_1 = arith.constant 0 : i32
    return %c0_i32, %c0_i32_0 : i32, i32
  }
  func.func @transform_6(%arg0: i32, %arg1: i32) -> (i32, i32) {
    %c0_i32 = arith.constant 0 : i32
    %c0_i32_0 = arith.constant 0 : i32
    %c0_i32_1 = arith.constant 0 : i32
    return %c0_i32, %c0_i32_0 : i32, i32
  }
  func.func @transform_7(%arg0: i32, %arg1: i32) -> (i32, i32) {
    %c0_i32 = arith.constant 0 : i32
    %c0_i32_0 = arith.constant 0 : i32
    %c0_i32_1 = arith.constant 0 : i32
    return %c0_i32, %c0_i32_0 : i32, i32
  }
  func.func @transform_8(%arg0: i32, %arg1: i32) -> (i32, i32) {
    %c0_i32 = arith.constant 0 : i32
    %c0_i32_0 = arith.constant 0 : i32
    %c0_i32_1 = arith.constant 0 : i32
    return %c0_i32, %c0_i32_0 : i32, i32
  }
  func.func @transform_9(%arg0: i32, %arg1: i32) -> (i32, i32) {
    %c0_i32 = arith.constant 0 : i32
    %c0_i32_0 = arith.constant 0 : i32
    return %arg0, %c0_i32 : i32, i32
  }
}

</mosaic_0001>

<bundles_post_ra>
// kernel: tpu_custom_call.1
= control target key start
LH: loop header
LB: loop body
LE: loop exit
PB: predicated region body
PF: predicated region fallthrough
CT: control target
= control target key end

     0   :  { %14 = vsyncpa [#allocation4], 0  ;;  %s1153_s0 = inlined_call_operand.hbm [shape: f32[8,128], index: 0, kind: input, shape index: {}]   ;;  %s1154_s1 = inlined_call_operand.hbm [shape: bf16[128,128], index: 1, kind: input, shape index: {}]   ;;  %s1155_s2 = inlined_call_operand.vmem [shape: f32[1,128], index: 2, kind: input, shape index: {}]   ;;  %s1156_s3 = inlined_call_operand.hbm [shape: f32[128,128], index: 3, kind: input, shape index: {}]   ;;  %s1157_s4 = inlined_call_operand.vmem [shape: f32[1,128], index: 4, kind: input, shape index: {}]   ;;  %s1158_s5 = inlined_call_operand.hbm [shape: f32[128,128], index: 5, kind: input, shape index: {}]   ;;  %s1159_s6 = inlined_call_operand.vmem [shape: f32[1,128], index: 6, kind: input, shape index: {}]   ;;  %s1160_s7 = inlined_call_operand.hbm [shape: f32[128,128], index: 7, kind: input, shape index: {}]   ;;  %s1161_s8 = inlined_call_operand.vmem [shape: f32[1,128], index: 8, kind: input, shape index: {}]   ;;  %s1162_s9 = inlined_call_operand.hbm [shape: bf16[8,128], index: 9, kind: output, shape index: {}]  }
   0x1   :  { %15 = vsyncpa [#allocation7], 0 }
   0x2   :  { %16 = vsyncpa [#allocation10], 0 }
   0x3   :  { %17 = vsyncpa [#allocation5], 0  ;;  %s957_s30 = smov [#allocation6]   ;;  %s817_s13 = scalar_lea.hbm %s1154_s1, 1024 }
   0x4   :  { %s33_s10 = sshll.u32 %s957_s30, 4  ;;  %p818_p0 = scmp.ne.s32.totalorder %s1154_s1, %s817_s13  ;;  %s34_s10 = int_to_ptr.vmem [resolvable:$true] %s33_s10 }
   0x5   :  { %p821_p1 = scmp.lt.u32.totalorder %s817_s13, %s1154_s1 }
   0x7   :  { %p823_p2 = pnand %p821_p1, %p818_p0 }
   0x9   :  { %826 = shalt.err (!%p823_p2)
}
   0xa   :  { %s827_s18 = scalar_lea.vmem %s34_s10, 1024  ;;  %p832_p4 = scmp.lt.s32.totalorder %s34_s10, %s34_s10 }
   0xb   :  { %p828_p3 = scmp.ne.s32.totalorder %s34_s10, %s827_s18  ;;  %p833_p5 = scmp.lt.s32.totalorder %s827_s18, %s827_s18 }
   0xd   :  { %p834_p6 = por %p833_p5, %p832_p4 }
   0xf   :  { %p835_p7 = pnand %p834_p6, %p828_p3 }
  0x11   :  { %838 = shalt.err (!%p835_p7)
}
  0x12   :  { %s958_s19 = smov 64   ;;  %s959_s20 = smov 4  }
  0x13   :  { %39 = dma.hbm_to_vmem [thread:$0]  %s1154_s1, 1024, %s34_s10, [#allocation7], %s958_s19, %s958_s19, %s959_s20  }
  0x14   :  { %s960_s23 = smov [#allocation9]   ;;  %s961_s25 = smov [#allocation3]  }
  0x15   :  { %s61_s24 = sshll.u32 %s960_s23, 4  ;;  %s24_s26 = sshll.u32 %s961_s25, 4  ;;  %s62_s24 = int_to_ptr.vmem [resolvable:$true] %s61_s24  ;;  %s25_s26 = int_to_ptr.vmem [resolvable:$true] %s24_s26 }
  0x16   :  { %s839_s29 = scalar_lea.hbm %s1158_s5, 2048 }
  0x17   :  { %p840_p8 = scmp.ne.s32.totalorder %s1158_s5, %s839_s29  ;;  %p843_p9 = scmp.lt.u32.totalorder %s839_s29, %s1158_s5 }
  0x19   :  { %p845_p10 = pnand %p843_p9, %p840_p8 }
  0x1b   :  { %848 = shalt.err (!%p845_p10)
}
  0x1c   :  { %s849_s1 = scalar_lea.vmem %s62_s24, 2048  ;;  %p854_p12 = scmp.lt.s32.totalorder %s62_s24, %s62_s24 }
  0x1d   :  { %p850_p11 = scmp.ne.s32.totalorder %s62_s24, %s849_s1  ;;  %p855_p13 = scmp.lt.s32.totalorder %s849_s1, %s849_s1 }
  0x1f   :  { %p856_p0 = por %p855_p13, %p854_p12 }
  0x21   :  { %p857_p1 = pnand %p856_p0, %p850_p11 }
  0x23   :  { %860 = shalt.err (!%p857_p1)
}
  0x24   :  { %s962_s10 = smov 128   ;;  %s963_s14 = smov 8  }
  0x25   :  { %67 = dma.hbm_to_vmem [thread:$0]  %s1158_s5, 2048, %s62_s24, [#allocation10], %s962_s10, %s962_s10, %s963_s14  }
  0x26   :  { %s861_s19 = scalar_lea.hbm %s1153_s0, 128 }
  0x27   :  { %p862_p2 = scmp.ne.s32.totalorder %s1153_s0, %s861_s19  ;;  %p865_p3 = scmp.lt.u32.totalorder %s861_s19, %s1153_s0 }
  0x29   :  { %p867_p4 = pnand %p865_p3, %p862_p2 }
  0x2b   :  { %870 = shalt.err (!%p867_p4)
}
  0x2c   :  { %s871_s25 = scalar_lea.vmem %s25_s26, 128  ;;  %p876_p6 = scmp.lt.s32.totalorder %s25_s26, %s25_s26 }
  0x2d   :  { %p872_p5 = scmp.ne.s32.totalorder %s25_s26, %s871_s25  ;;  %p877_p7 = scmp.lt.s32.totalorder %s871_s25, %s871_s25 }
  0x2f   :  { %p878_p8 = por %p877_p7, %p876_p6 }
  0x31   :  { %p879_p9 = pnand %p878_p8, %p872_p5 }
  0x33   :  { %882 = shalt.err (!%p879_p9)
}
  0x34   :  { %27 = dma.hbm_to_vmem [thread:$0]  %s1153_s0, 128, %s25_s26, [#allocation4]  }
  0x35   :  { %s964_s27 = smov [#allocation8]   ;;  %s965_s29 = smov [#allocation11]  }
  0x36   :  { %s47_s28 = sshll.u32 %s964_s27, 4  ;;  %s75_s30 = sshll.u32 %s965_s29, 4  ;;  %s48_s28 = int_to_ptr.vmem [resolvable:$true] %s47_s28  ;;  %s76_s30 = int_to_ptr.vmem [resolvable:$true] %s75_s30 }
  0x37   :  { %s883_s13 = scalar_lea.hbm %s1156_s3, 2048 }
  0x38   :  { %p884_p10 = scmp.ne.s32.totalorder %s1156_s3, %s883_s13  ;;  %p887_p11 = scmp.lt.u32.totalorder %s883_s13, %s1156_s3 }
  0x3a   :  { %p889_p12 = pnand %p887_p11, %p884_p10 }
  0x3c   :  { %892 = shalt.err (!%p889_p12)
}
  0x3d   :  { %s893_s0 = scalar_lea.vmem %s48_s28, 2048  ;;  %p898_p0 = scmp.lt.s32.totalorder %s48_s28, %s48_s28 }
  0x3e   :  { %p894_p13 = scmp.ne.s32.totalorder %s48_s28, %s893_s0  ;;  %p899_p1 = scmp.lt.s32.totalorder %s893_s0, %s893_s0 }
  0x40   :  { %p900_p2 = por %p899_p1, %p898_p0 }
  0x42   :  { %p901_p3 = pnand %p900_p2, %p894_p13 }
  0x44   :  { %904 = shalt.err (!%p901_p3)
}
  0x45   :  { %53 = dma.hbm_to_vmem [thread:$0]  %s1156_s3, 2048, %s48_s28, [#allocation7], %s962_s10, %s962_s10, %s963_s14  }
  0x46   :  { %s905_s21 = scalar_lea.hbm %s1160_s7, 2048 }
  0x47   :  { %p906_p4 = scmp.ne.s32.totalorder %s1160_s7, %s905_s21  ;;  %p909_p5 = scmp.lt.u32.totalorder %s905_s21, %s1160_s7 }
  0x49   :  { %p911_p6 = pnand %p909_p5, %p906_p4 }
  0x4b   :  { %914 = shalt.err (!%p911_p6)
}
  0x4c   :  { %s915_s24 = scalar_lea.vmem %s76_s30, 2048  ;;  %p920_p8 = scmp.lt.s32.totalorder %s76_s30, %s76_s30 }
  0x4d   :  { %p916_p7 = scmp.ne.s32.totalorder %s76_s30, %s915_s24  ;;  %p921_p9 = scmp.lt.s32.totalorder %s915_s24, %s915_s24 }
  0x4f   :  { %p922_p10 = por %p921_p9, %p920_p8 }
  0x51   :  { %p923_p11 = pnand %p922_p10, %p916_p7 }
  0x53   :  { %926 = shalt.err (!%p923_p11)
}
  0x54   :  { %81 = dma.hbm_to_vmem [thread:$0]  %s1160_s7, 2048, %s76_s30, [#allocation10], %s962_s10, %s962_s10, %s963_s14  }
  0x55   :  { %949 = dma.done.wait [#allocation4], 128  }
  0x56   :  { %950 = vsyncadd [#allocation4], 4294967168 }
  0x57   :  { %951 = dma.done.wait [#allocation7], 3072  }
  0x58   :  { %952 = vsyncadd [#allocation7], 4294964224 }
  0x59   :  { %953 = dma.done.wait [#allocation10], 4096  }
  0x5a   :  { %954 = vsyncadd [#allocation10], 4294963200  ;;  %v966_v0 = vmov 0.0   ;;  %vm967_vm0 = vmmov 0   ;;  %v968_v1 = vmov 0.0|0.0   ;;  %v809_v2 = vld [vmem:[#allocation6] sm:$0xff]  }
  0x5b   :  { %599 = vmatprep.subr.bf16.mxu0 %v966_v0  ;;  %615 = vmatprep.mubr.msk.bf16.mxu0 %vm967_vm0, %v966_v0  ;;  %v810_v3 = vld [vmem:[#allocation6 + $0x8] sm:$0xff]   ;;  %v811_v4 = vld [vmem:[#allocation6 + $0x10] sm:$0xff]   ;;  %v227_v5 = vld [vmem:[#allocation8] sm:$0xff]  ;;  %s969_s11 = smov [#allocation12]  }
  0x5c   :  { %724 = vmatprep.subr.bf16.mxu1 %v968_v1  ;;  %651 = vmatprep.mubr.msk.f32.mxu1 %vm967_vm0, %v966_v0  ;;  %v228_v6 = vld [vmem:[#allocation8 + $0x8] sm:$0xff]  ;;  %v229_v8 = vld [vmem:[#allocation8 + $0x10] sm:$0xff]  ;;  %v230_v9 = vld [vmem:[#allocation8 + $0x18] sm:$0xff]  ;;  %s516_s12 = sshll.u32 %s969_s11, 4  ;;  %s517_s12 = int_to_ptr.vmem [resolvable:$true] %s516_s12 }
  0x5d   :  { %600 = vmatpush3.bf16.msra.mxu0 %v809_v2  ;;  %v725_v7 = vpack.c.bf16 %v228_v6, %v227_v5  ;;  %v812_v10 = vld [vmem:[#allocation6 + $0x18] sm:$0xff]   ;;  %v728_v11 = vpack.c.bf16 %v230_v9, %v229_v8  ;;  %v231_v12 = vld [vmem:[#allocation8 + $0x20] sm:$0xff]  ;;  %v232_v13 = vld [vmem:[#allocation8 + $0x28] sm:$0xff]  ;;  %s927_s13 = scalar_lea.vmem %s517_s12, 64  ;;  %p932_p13 = scmp.lt.s32.totalorder %s517_s12, %s517_s12 }
  0x5e   :  { %601 = vmatprep.subr.bf16.mxu0 %v966_v0  ;;  %v813_v14 = vld [vmem:[#allocation6 + $0x20] sm:$0xff]   ;;  %v731_v15 = vpack.c.bf16 %v232_v13, %v231_v12  ;;  %v233_v16 = vld [vmem:[#allocation8 + $0x30] sm:$0xff]  ;;  %v234_v17 = vld [vmem:[#allocation8 + $0x38] sm:$0xff]  ;;  %p928_p12 = scmp.ne.s32.totalorder %s517_s12, %s927_s13  ;;  %p933_p0 = scmp.lt.s32.totalorder %s927_s13, %s927_s13 }
  0x5f   :  { %726 = vmatpush3.bf16.msra.mxu1 %v725_v7  ;;  %v814_v18 = vld [vmem:[#allocation6 + $0x28] sm:$0xff]   ;;  %v734_v19 = vpack.c.bf16 %v234_v17, %v233_v16  ;;  %v235_v20 = vld [vmem:[#allocation8 + $0x40] sm:$0xff]  ;;  %v815_v22 = vld [vmem:[#allocation6 + $0x30] sm:$0xff]  }
  0x60   :  { %727 = vmatprep.subr.bf16.mxu1 %v968_v1  ;;  %v236_v21 = vld [vmem:[#allocation8 + $0x48] sm:$0xff]  ;;  %v237_v24 = vld [vmem:[#allocation8 + $0x50] sm:$0xff]  ;;  %v238_v25 = vld [vmem:[#allocation8 + $0x58] sm:$0xff]  ;;  %p934_p1 = por %p933_p0, %p932_p13 }
  0x61   :  { %602 = vmatpush3.bf16.msra.mxu0 %v810_v3  ;;  %v737_v23 = vpack.c.bf16 %v236_v21, %v235_v20  ;;  %v816_v26 = vld [vmem:[#allocation6 + $0x38] sm:$0xff]   ;;  %v740_v28 = vpack.c.bf16 %v238_v25, %v237_v24  ;;  %v239_v29 = vld [vmem:[#allocation8 + $0x60] sm:$0xff]  ;;  %v240_v30 = vld [vmem:[#allocation8 + $0x68] sm:$0xff] }
  0x62   :  { %603 = vmatprep.subr.bf16.mxu0 %v966_v0  ;;  %v105_v27 = vld [vmem:[#allocation3] sm:$0xff]  ;;  %v743_v32 = vpack.c.bf16 %v240_v30, %v239_v29  ;;  %v241_v33 = vld [vmem:[#allocation8 + $0x70] sm:$0xff]  ;;  %v321_v36 = vld [vmem:[#allocation9] sm:$0xff]  ;;  %p935_p2 = pnand %p934_p1, %p928_p12 }
  0x63   :  { %729 = vmatpush3.bf16.msra.mxu1 %v728_v11  ;;  %v107_v31 = vpack.c.bf16 %v105_v27, %v105_v27  ;;  %v242_v34 = vld [vmem:[#allocation8 + $0x78] sm:$0xff]  ;;  %v322_v37 = vld [vmem:[#allocation9 + $0x8] sm:$0xff]  ;;  %v323_v38 = vld [vmem:[#allocation9 + $0x10] sm:$0xff] }
  0x64   :  { %730 = vmatprep.subr.bf16.mxu1 %v968_v1  ;;  %v746_v35 = vpack.c.bf16 %v242_v34, %v241_v33  ;;  %v749_v39 = vpack.c.bf16 %v322_v37, %v321_v36  ;;  %v324_v40 = vld [vmem:[#allocation9 + $0x18] sm:$0xff]  ;;  %v325_v42 = vld [vmem:[#allocation9 + $0x20] sm:$0xff]  ;;  %v326_v43 = vld [vmem:[#allocation9 + $0x28] sm:$0xff] }
  0x65   :  { %604 = vmatpush3.bf16.msra.mxu0 %v811_v4  ;;  %v752_v41 = vpack.c.bf16 %v324_v40, %v323_v38  ;;  %v755_v44 = vpack.c.bf16 %v326_v43, %v325_v42  ;;  %v327_v45 = vld [vmem:[#allocation9 + $0x30] sm:$0xff]  ;;  %v328_v46 = vld [vmem:[#allocation9 + $0x38] sm:$0xff]  ;;  %v329_v48 = vld [vmem:[#allocation9 + $0x40] sm:$0xff] }
  0x66   :  { %605 = vmatprep.subr.bf16.mxu0 %v966_v0  ;;  %v758_v47 = vpack.c.bf16 %v328_v46, %v327_v45  ;;  %v330_v49 = vld [vmem:[#allocation9 + $0x48] sm:$0xff]  ;;  %v331_v51 = vld [vmem:[#allocation9 + $0x50] sm:$0xff]  ;;  %v332_v52 = vld [vmem:[#allocation9 + $0x58] sm:$0xff] }
  0x67   :  { %732 = vmatpush3.bf16.msra.mxu1 %v731_v15  ;;  %v761_v50 = vpack.c.bf16 %v330_v49, %v329_v48  ;;  %v764_v53 = vpack.c.bf16 %v332_v52, %v331_v51  ;;  %v333_v54 = vld [vmem:[#allocation9 + $0x60] sm:$0xff]  ;;  %v334_v55 = vld [vmem:[#allocation9 + $0x68] sm:$0xff]  ;;  %v535_v57 = vld [vmem:[%s1155_s2] ss:$0 sm:$0xff] }
  0x68   :  { %733 = vmatprep.subr.bf16.mxu1 %v968_v1  ;;  %v767_v56 = vpack.c.bf16 %v334_v55, %v333_v54  ;;  %v335_v2 = vld [vmem:[#allocation9 + $0x70] sm:$0xff]  ;;  %v336_v3 = vld [vmem:[#allocation9 + $0x78] sm:$0xff]  ;;  %v415_v5 = vld [vmem:[#allocation11] sm:$0xff] }
  0x69   :  { %606 = vmatpush3.bf16.msra.mxu0 %v812_v10  ;;  %v770_v4 = vpack.c.bf16 %v336_v3, %v335_v2  ;;  %v416_v6 = vld [vmem:[#allocation11 + $0x8] sm:$0xff]  ;;  %v417_v7 = vld [vmem:[#allocation11 + $0x10] sm:$0xff]  ;;  %v418_v9 = vld [vmem:[#allocation11 + $0x18] sm:$0xff] }
  0x6a   :  { %607 = vmatprep.subr.bf16.mxu0 %v966_v0  ;;  %v773_v8 = vpack.c.bf16 %v416_v6, %v415_v5  ;;  %v776_v10 = vpack.c.bf16 %v418_v9, %v417_v7  ;;  %v419_v11 = vld [vmem:[#allocation11 + $0x20] sm:$0xff]  ;;  %v420_v12 = vld [vmem:[#allocation11 + $0x28] sm:$0xff]  ;;  %v426_v20 = vld [vmem:[#allocation11 + $0x58] sm:$0xff] }
  0x6b   :  { %735 = vmatpush3.bf16.msra.mxu1 %v734_v19  ;;  %v779_v13 = vpack.c.bf16 %v420_v12, %v419_v11  ;;  %v423_v16 = vld [vmem:[#allocation11 + $0x40] sm:$0xff]  ;;  %v424_v17 = vld [vmem:[#allocation11 + $0x48] sm:$0xff]  ;;  %v425_v19 = vld [vmem:[#allocation11 + $0x50] sm:$0xff] }
  0x6c   :  { %736 = vmatprep.subr.bf16.mxu1 %v968_v1  ;;  %v788_v21 = vpack.c.bf16 %v426_v20, %v425_v19  ;;  %v536_v25 = vld [vmem:[%s1157_s4] ss:$0 sm:$0xff]  ;;  %v429_v30 = vld [vmem:[#allocation11 + $0x70] sm:$0xff] }
  0x6d   :  { %608 = vmatpush3.bf16.msra.mxu0 %v813_v14  ;;  %v422_v14 = vld [vmem:[#allocation11 + $0x38] sm:$0xff] }
  0x6e   :  { %609 = vmatprep.subr.bf16.mxu0 %v966_v0  ;;  %v537_v33 = vld [vmem:[%s1159_s6] ss:$0 sm:$0xff] }
  0x6f   :  { %738 = vmatpush3.bf16.msra.mxu1 %v737_v23  ;;  %v428_v23 = vld [vmem:[#allocation11 + $0x68] sm:$0xff]  ;;  %v538_v37 = vld [vmem:[%s1161_s8] ss:$0 sm:$0xff] }
  0x70   :  { %739 = vmatprep.subr.bf16.mxu1 %v968_v1 }
  0x71   :  { %610 = vmatpush3.bf16.msra.mxu0 %v814_v18  ;;  %v785_v18 = vpack.c.bf16 %v424_v17, %v423_v16 }
  0x72   :  { %611 = vmatprep.subr.bf16.mxu0 %v966_v0 }
  0x73   :  { %741 = vmatpush3.bf16.msra.mxu1 %v740_v28 }
  0x74   :  { %742 = vmatprep.subr.bf16.mxu1 %v968_v1 }
  0x75   :  { %612 = vmatpush3.bf16.msra.mxu0 %v815_v22  ;;  %v427_v22 = vld [vmem:[#allocation11 + $0x60] sm:$0xff] }
  0x76   :  { %613 = vmatprep.subr.bf16.mxu0 %v966_v0  ;;  %v791_v24 = vpack.c.bf16 %v428_v23, %v427_v22 }
  0x77   :  { %744 = vmatpush3.bf16.msra.mxu1 %v743_v32 }
  0x78   :  { %745 = vmatprep.subr.bf16.mxu1 %v968_v1 }
  0x79   :  { %614 = vmatpush3.bf16.msra.mxu0 %v816_v26 }
  0x7a   :  { %748 = vmatprep.subr.bf16.mxu0 %v968_v1 }
  0x7b   :  { %747 = vmatpush3.bf16.msra.mxu1 %v746_v35 }
  0x7c   :  { %616 = vmatmul.mubr.bf16.vlgmr.msra.gmra.mrb[0].mxu0 %v107_v31  ;;  %772 = vmatprep.subr.bf16.mxu1 %v968_v1  ;;  %v430_v31 = vld [vmem:[#allocation11 + $0x78] sm:$0xff] }
  0x7d   :  { %686 = vmatprep.mubr.msk.f32.mxu0 %vm967_vm0, %v966_v0  ;;  %750 = vmatpush3.bf16.msra.mxu0 %v749_v39  ;;  %v794_v32 = vpack.c.bf16 %v430_v31, %v429_v30 }
  0x7e   :  { %751 = vmatprep.subr.bf16.mxu0 %v968_v1 }
  0x81   :  { %753 = vmatpush3.bf16.msra.mxu0 %v752_v41 }
  0x82   :  { %754 = vmatprep.subr.bf16.mxu0 %v968_v1 }
  0x85   :  { %756 = vmatpush3.bf16.msra.mxu0 %v755_v44 }
  0x86   :  { %757 = vmatprep.subr.bf16.mxu0 %v968_v1 }
  0x89   :  { %759 = vmatpush3.bf16.msra.mxu0 %v758_v47 }
  0x8a   :  { %760 = vmatprep.subr.bf16.mxu0 %v968_v1 }
  0x8d   :  { %762 = vmatpush3.bf16.msra.mxu0 %v761_v50 }
  0x8e   :  { %763 = vmatprep.subr.bf16.mxu0 %v968_v1 }
  0x91   :  { %765 = vmatpush3.bf16.msra.mxu0 %v764_v53 }
  0x92   :  { %766 = vmatprep.subr.bf16.mxu0 %v968_v1 }
  0x95   :  { %768 = vmatpush3.bf16.msra.mxu0 %v767_v56 }
  0x96   :  { %769 = vmatprep.subr.bf16.mxu0 %v968_v1 }
  0x99   :  { %771 = vmatpush3.bf16.msra.mxu0 %v770_v4 }
 0x14f   :  { %v206_v58 = vpop.f32.mrb[0].mxu0 }
 0x150   :  { %v225_v59 = vadd.f32 %v535_v57, %v206_v58  ;;  %v617_v60 = vpop.f32.mrb[1].mxu0 }
 0x151   :  { %v209_v61 = vpop.f32.mrb[2].mxu0 }
 0x152   :  { %v226_v62 = vmax.f32 %v225_v59, 0.0  ;;  %v618_v63 = vpop.f32.mrb[3].mxu0 }
 0x154   :  { %652 = vmatmul.mubr.f32.vlgmr.msra.gmra.mrb[0].mxu1 %v226_v62 }
 0x155   :  { %721 = vmatprep.mubr.msk.f32.mxu1 %vm967_vm0, %v966_v0  ;;  %774 = vmatpush3.bf16.msra.mxu1 %v773_v8  ;;  %v421_v0 = vld [vmem:[#allocation11 + $0x30] sm:$0xff] }
 0x156   :  { %775 = vmatprep.subr.bf16.mxu1 %v968_v1  ;;  %v782_v15 = vpack.c.bf16 %v422_v14, %v421_v0 }
 0x159   :  { %777 = vmatpush3.bf16.msra.mxu1 %v776_v10 }
 0x15a   :  { %778 = vmatprep.subr.bf16.mxu1 %v968_v1 }
 0x15d   :  { %780 = vmatpush3.bf16.msra.mxu1 %v779_v13 }
 0x15e   :  { %781 = vmatprep.subr.bf16.mxu1 %v968_v1 }
 0x161   :  { %783 = vmatpush3.bf16.msra.mxu1 %v782_v15 }
 0x162   :  { %784 = vmatprep.subr.bf16.mxu1 %v968_v1 }
 0x165   :  { %786 = vmatpush3.bf16.msra.mxu1 %v785_v18 }
 0x166   :  { %787 = vmatprep.subr.bf16.mxu1 %v968_v1 }
 0x169   :  { %789 = vmatpush3.bf16.msra.mxu1 %v788_v21 }
 0x16a   :  { %790 = vmatprep.subr.bf16.mxu1 %v968_v1 }
 0x16d   :  { %792 = vmatpush3.bf16.msra.mxu1 %v791_v24 }
 0x16e   :  { %793 = vmatprep.subr.bf16.mxu1 %v968_v1 }
 0x171   :  { %795 = vmatpush3.bf16.msra.mxu1 %v794_v32 }
 0x227   :  { %v316_v26 = vpop.f32.mrb[0].mxu1 }
 0x228   :  { %v317_v27 = vadd.f32 %v536_v25, %v316_v26  ;;  %v653_v28 = vpop.f32.mrb[1].mxu1 }
 0x22a   :  { %v320_v29 = vmax.f32 %v317_v27, 0.0 }
 0x22c   :  { %687 = vmatmul.mubr.f32.vlgmr.msra.gmra.mrb[4].mxu0 %v320_v29 }
 0x2ff   :  { %v410_v34 = vpop.f32.mrb[4].mxu0 }
 0x300   :  { %v411_v35 = vadd.f32 %v537_v33, %v410_v34  ;;  %v688_v1 = vpop.f32.mrb[5].mxu0 }
 0x302   :  { %v414_v36 = vmax.f32 %v411_v35, 0.0 }
 0x304   :  { %722 = vmatmul.mubr.f32.vlgmr.msra.gmra.mrb[2].mxu1 %v414_v36 }
 0x3d7   :  { %v504_v38 = vpop.f32.mrb[2].mxu1 }
 0x3d8   :  { %v505_v39 = vadd.f32 %v538_v37, %v504_v38  ;;  %v723_v40 = vpop.f32.mrb[3].mxu1 }
 0x3da   :  { %v508_v41 = vpack.c.bf16 %v505_v39, %v505_v39 }
 0x3dc   :  { %509 = vst [vmem:[#allocation12] sm:$0xf] %v508_v41 }
 0x3dd   :  { %938 = shalt.err (!%p935_p2)
}
 0x3de   :  { %s939_s15 = scalar_lea.hbm %s1162_s9, 64 }
 0x3df   :  { %p940_p3 = scmp.ne.s32.totalorder %s1162_s9, %s939_s15  ;;  %p943_p4 = scmp.lt.u32.totalorder %s939_s15, %s1162_s9 }
 0x3e1   :  { %p945_p5 = pnand %p943_p4, %p940_p3 }
 0x3e3   :  { %948 = shalt.err (!%p945_p5)
}
 0x3e4   :  { %519 = dma.vmem_to_hbm [thread:$0]  %s517_s12, 64, %s1162_s9, [#allocation5]  }
 0x3e5   :  { %955 = dma.done.wait [#allocation5], 64  }
 0x3e6   :  { %956 = vsyncadd [#allocation5], 4294967232 }
 0x3e7   :  { %523 = vsyncpa [#allocation4], 1 }
 0x3e8   :  { %524 = vsyncpa [#allocation7], 1 }
 0x3e9   :  { %525 = vsyncpa [#allocation10], 1 }
 0x3ea   :  { %526 = vsyncpa [#allocation5], 1 }

</bundles_post_ra>
